<compile_context>
chip_gen: v6e
topology: v6e:2x2x1
jax: 0.10.0
libtpu: 0.0.40
codegen_flags: <defaults>
</compile_context>

<pallas_src>
import functools

import jax
import jax.numpy as jnp
from jax.experimental import pallas as pl
from jax.experimental.pallas import tpu as pltpu

DEPTH = 4
INIT_K_SIZE = 3
SCALE_FACTOR = 4
K_SIZES = tuple(INIT_K_SIZE + k * SCALE_FACTOR for k in range(DEPTH))  # (3, 7, 11, 15)
K_MAX = max(K_SIZES)                      # 15
K_PAD = K_MAX // 2                        # 7  center tap index in the stacked weights
CPAD = K_MAX // 2                         # 7  zero-pad rows on each side of the scratch
HALO = sum(k // 2 for k in K_SIZES)       # 16 cumulative halo of the 4 chained convs


def _pka_kernel(x_ref, cw_ref, shift_ref, wf_ref, bf_ref, o_ref, scr_ref,
                *, ts, n_s, rem):
    # x_ref:     (S_pad, D)        zero-padded sequence of one batch element (VMEM resident)
    # cw_ref:    (DEPTH, K_MAX, D) conv taps * BN scale, center aligned, zeros elsewhere
    # shift_ref: (DEPTH, D)        BN eval shift = beta - mean * scale
    # wf_ref:    (D, D) bf16       out_ffn weight stored (in, out)
    # bf_ref:    (1, D) f32        out_ffn bias
    # o_ref:     (TS, D)           output rows of this sequence tile
    # scr_ref:   (TS + 2*HALO + 2*CPAD, D) f32 zero-padded staging scratch
    L = ts + 2 * HALO
    D = o_ref.shape[-1]
    si = pl.program_id(1)

    # Outer CPAD rows provide the per-layer zero "same" padding for the tap
    # slices; they are never written elsewhere, so refresh them each step.
    scr_ref[pl.ds(0, CPAD), :] = jnp.zeros((CPAD, D), jnp.float32)
    scr_ref[pl.ds(CPAD + L, CPAD), :] = jnp.zeros((CPAD, D), jnp.float32)

    start = si * ts
    if ts % 8 == 0:
        start = pl.multiple_of(start, 8)
    # Layer input over the local window [g0 - HALO, g0 + TS + HALO) of the
    # (host zero-padded) sequence.
    cur = x_ref[pl.ds(start, L), :]

    x_all = None
    for i, k in enumerate(K_SIZES):          # static Python loop -> fully unrolled
        p = k // 2
        # Stage this layer's input into the scratch middle; taps below are then
        # static-offset slices -> only mul+add on the VPU (no roll/compare/select).
        scr_ref[pl.ds(CPAD, L), :] = cur
        if i > 0:
            # Re-impose the *global* zero padding of the chained convs: rows of
            # c_i lying outside [0, S) must read back as zeros for layer i+1.
            # Only the first / last sequence tiles contain such rows.
            @pl.when(si == 0)
            def _():
                scr_ref[pl.ds(CPAD, HALO), :] = jnp.zeros((HALO, D), jnp.float32)

            @pl.when(si == n_s - 1)
            def _():
                tail = L - HALO - rem
                scr_ref[pl.ds(CPAD + HALO + rem, tail), :] = (
                    jnp.zeros((tail, D), jnp.float32))

        # Depthwise conv: acc seeded with the center tap; BN scale is already
        # folded into cw_ref.  Tap-weight reads are tiny (1, D) VMEM loads on
        # the (slack) load slots.
        acc = cur * cw_ref[i, pl.ds(K_PAD, 1), :]
        for d in range(-p, p + 1):
            if d == 0:
                continue
            acc = acc + scr_ref[pl.ds(CPAD + d, L), :] * cw_ref[i, pl.ds(K_PAD + d, 1), :]
        cur = jnp.maximum(acc + shift_ref[pl.ds(i, 1), :], 0.0)   # BN shift + ReLU
        x_all = cur if i == 0 else x_all + cur                    # running layer sum

    # out_ffn on the MXU: bf16 operands, f32 accumulation, over the TS output rows.
    rows = x_all[HALO:HALO + ts, :].astype(jnp.bfloat16)
    y = jnp.dot(rows, wf_ref[...], preferred_element_type=jnp.float32) + bf_ref[...]
    o_ref[...] = y.astype(o_ref.dtype)


def pka_forward(x, conv_w_stacked, bn_scale, bn_shift, w_ffn, b_ffn, *, ts_target=512):
    """x: (B, S, D) f32.  conv_w_stacked: (DEPTH, K_MAX, D) center-aligned taps.
    bn_scale / bn_shift: (DEPTH, D) folded eval-mode BatchNorm.  w_ffn: (D, D)
    stored (in, out).  b_ffn: (D,).  Returns (B, S, D) f32."""
    B, S, D = x.shape

    # ---- host-side weight prep --------------------------------------------
    # Fold BN scale into the conv taps; kernel epilogue is then max(acc+shift,0).
    cw_folded = (conv_w_stacked * bn_scale[:, None, :]).astype(jnp.float32)
    wf_bf16 = w_ffn.astype(jnp.bfloat16)          # bf16 operands / f32 accumulate
    b_ffn_2d = b_ffn.reshape(1, D).astype(jnp.float32)

    # ---- sequence tiling ----------------------------------------------------
    ts = S if S <= ts_target else ts_target
    n_s = pl.cdiv(S, ts)
    s_round = n_s * ts
    rem = S - (n_s - 1) * ts                      # real rows in the last tile
    s_pad_total = s_round + 2 * HALO
    # Zero "same" padding of the first conv + round-up tail, done once on host.
    x_pad = jnp.pad(x, ((0, 0), (HALO, s_round - S + HALO), (0, 0)))

    kernel = functools.partial(_pka_kernel, ts=ts, n_s=n_s, rem=rem)

    conv_flops = 2 * B * s_round * D * sum(K_SIZES)
    ffn_flops = 2 * B * s_round * D * D
    bytes_accessed = (4 * (B * s_pad_total * D + B * s_round * D
                           + cw_folded.size + bn_shift.size + D)
                      + 2 * w_ffn.size)

    out = pl.pallas_call(
        kernel,
        out_shape=jax.ShapeDtypeStruct((B, s_round, D), x.dtype),
        grid_spec=pltpu.PrefetchScalarGridSpec(
            num_scalar_prefetch=0,
            grid=(B, n_s),
            in_specs=[
                # Full padded sequence of one batch element; constant over the
                # sequence-tile axis so it is fetched once per batch element
                # and stays VMEM resident while its tiles are processed.
                # TODO(synk): for very long S, stream x with a manual halo DMA
                # instead of keeping the whole padded sequence resident.
                pl.BlockSpec((None, s_pad_total, D), lambda b, s: (b, 0, 0)),
                # Weights: constant index maps -> VMEM resident across the grid.
                pl.BlockSpec((DEPTH, K_MAX, D), lambda b, s: (0, 0, 0)),
                pl.BlockSpec((DEPTH, D), lambda b, s: (0, 0)),
                pl.BlockSpec((D, D), lambda b, s: (0, 0)),
                pl.BlockSpec((1, D), lambda b, s: (0, 0)),
            ],
            out_specs=pl.BlockSpec((None, ts, D), lambda b, s: (b, s, 0)),
            scratch_shapes=[pltpu.VMEM((ts + 2 * HALO + 2 * CPAD, D), jnp.float32)],
        ),
        compiler_params=pltpu.CompilerParams(
            # Both axes are independent: shard across TensorCores even when B
            # is small (the review's v7x load-balance concern).
            dimension_semantics=("parallel", "parallel"),
            vmem_limit_bytes=32 * 1024 * 1024,    # v7x-safe (64 MiB physical)
        ),
        cost_estimate=pl.CostEstimate(
            flops=conv_flops + ffn_flops,
            transcendentals=0,
            bytes_accessed=bytes_accessed,
        ),
    )(x_pad, cw_folded, bn_shift, wf_bf16, b_ffn_2d)

    return out if s_round == S else out[:, :S, :]


def pka_reference(x, conv_w_list, bn_scale, bn_shift, w_ffn, b_ffn):
    """Pure-JAX reference with identical (eval-mode) semantics."""
    B, S, D = x.shape
    cur = x
    x_all = jnp.zeros_like(x)
    for i, w in enumerate(conv_w_list):      # w: (k, D)
        k = w.shape[0]
        p = k // 2
        xp = jnp.pad(cur, ((0, 0), (p, p), (0, 0)))
        acc = jnp.zeros_like(cur)
        for t in range(k):
            acc = acc + xp[:, t:t + S, :] * w[t][None, None, :]
        h = acc * bn_scale[i][None, None, :] + bn_shift[i][None, None, :]
        cur = jnp.maximum(h, 0.0)
        x_all = x_all + cur
    y = jnp.dot(x_all.reshape(B * S, D), w_ffn,
                precision=jax.lax.Precision.HIGHEST) + b_ffn[None, :]
    return y.reshape(B, S, D)


if __name__ == "__main__":
    dim_model = 128      # module default
    eps = 1e-5

    key = jax.random.PRNGKey(0)
    keys = jax.random.split(key, 3 + DEPTH)
    kx, kw, kb = keys[0], keys[1], keys[2]
    layer_keys = keys[3:]

    conv_w_list, bn_scale_rows, bn_shift_rows = [], [], []
    for i, k in enumerate(K_SIZES):
        k_w, k_g, k_be, k_m, k_v = jax.random.split(layer_keys[i], 5)
        # Depthwise conv weight per layer, stored (k, D); PyTorch-like 1/sqrt(k) scale.
        w = jax.random.uniform(k_w, (k, dim_model), jnp.float32,
                               minval=-1.0, maxval=1.0) / jnp.sqrt(k)
        conv_w_list.append(w)
        # Synthetic BatchNorm (eval mode) parameters / running stats.
        gamma = 1.0 + 0.1 * jax.random.normal(k_g, (dim_model,), jnp.float32)
        beta = 0.1 * jax.random.normal(k_be, (dim_model,), jnp.float32)
        running_mean = 0.1 * jax.random.normal(k_m, (dim_model,), jnp.float32)
        running_var = 0.5 + jnp.abs(jax.random.normal(k_v, (dim_model,), jnp.float32))
        scale = gamma / jnp.sqrt(running_var + eps)
        shift = beta - running_mean * scale
        bn_scale_rows.append(scale)
        bn_shift_rows.append(shift)

    bn_scale = jnp.stack(bn_scale_rows)      # (DEPTH, D)
    bn_shift = jnp.stack(bn_shift_rows)      # (DEPTH, D)

    # Center-align all kernels into one (DEPTH, K_MAX, D) stack (zeros elsewhere).
    conv_w_stacked = jnp.zeros((DEPTH, K_MAX, dim_model), jnp.float32)
    for i, w in enumerate(conv_w_list):
        k = w.shape[0]
        start = K_PAD - k // 2
        conv_w_stacked = conv_w_stacked.at[i, start:start + k, :].set(w)

    # out_ffn weights stored (in, out) = transpose of nn.Linear.weight.
    w_ffn = jax.random.uniform(kw, (dim_model, dim_model), jnp.float32,
                               minval=-1.0, maxval=1.0) / jnp.sqrt(dim_model)
    b_ffn = jax.random.uniform(kb, (dim_model,), jnp.float32,
                               minval=-1.0, maxval=1.0) / jnp.sqrt(dim_model)

    # (batch, seq, ts_target): small module-consistent shapes; the latter two
    # cases exercise the multi-tile halo path (and a non-divisible last tile).
    cases = [(2, 8, 512), (2, 48, 16), (1, 40, 16)]
    for ci, (batch, seq, ts_target) in enumerate(cases):
        x = jax.random.normal(jax.random.fold_in(kx, ci),
                              (batch, seq, dim_model), jnp.float32)
        out = pka_forward(x, conv_w_stacked, bn_scale, bn_shift, w_ffn, b_ffn,
                          ts_target=ts_target)
        jax.block_until_ready(out)
        ref = pka_reference(x, conv_w_list, bn_scale, bn_shift, w_ffn, b_ffn)
        assert out.shape == ref.shape, f"shape mismatch (case {ci})"
        # f32 conv math; bf16-operand / f32-accumulate final matmul stays well
        # inside this tolerance.
        assert jnp.allclose(out, ref, atol=1e-2, rtol=1e-2), \
            f"mismatch vs reference (case {ci})"

    print("KERNEL_OK")
</pallas_src>

<mosaic_0001>
module attributes {stable_mosaic.version = 11 : i64} {
  func.func @_pka_kernel(%arg0: i32, %arg1: i32, %arg2: memref<1x40x128xf32, #tpu.memory_space<vmem>>, %arg3: memref<4x15x128xf32, #tpu.memory_space<vmem>>, %arg4: memref<4x128xf32, #tpu.memory_space<vmem>>, %arg5: memref<128x128xbf16, #tpu.memory_space<vmem>>, %arg6: memref<1x128xf32, #tpu.memory_space<vmem>>, %arg7: memref<1x8x128xf32, #tpu.memory_space<vmem>>, %arg8: memref<54x128xf32, #tpu.memory_space<vmem>>) attributes {dimension_semantics = [#tpu.dimension_semantics<parallel>, #tpu.dimension_semantics<parallel>], iteration_bounds = array<i64: 2, 1>, scalar_prefetch = 0 : i64, scratch_operands = 1 : i64, tpu.core_type = #tpu.core_type<tc>, window_params = [{transform_indices = @transform_0, window_bounds = array<i64: 1, 40, 128>}, {pipeline_mode = #tpu.pipeline_mode<synchronous>, transform_indices = @transform_1, window_bounds = array<i64: 4, 15, 128>}, {pipeline_mode = #tpu.pipeline_mode<synchronous>, transform_indices = @transform_2, window_bounds = array<i64: 4, 128>}, {pipeline_mode = #tpu.pipeline_mode<synchronous>, transform_indices = @transform_3, window_bounds = array<i64: 128, 128>}, {pipeline_mode = #tpu.pipeline_mode<synchronous>, transform_indices = @transform_4, window_bounds = array<i64: 1, 128>}, {transform_indices = @transform_5, window_bounds = array<i64: 1, 8, 128>}]} {
    %cst = arith.constant 0.000000e+00 : f32
    %0 = vector.broadcast %cst : f32 to vector<7x128xf32>
    %c0 = arith.constant 0 : index
    %c0_0 = arith.constant 0 : index
    %1 = vector.load %arg8[%c0, %c0_0] : memref<54x128xf32, #tpu.memory_space<vmem>>, vector<7x128xf32>
    tpu.vector_store %arg8[%c0, %c0_0], %0 {strides = array<i32>} : memref<54x128xf32, #tpu.memory_space<vmem>>, vector<7x128xf32>,
    %cst_1 = arith.constant 0.000000e+00 : f32
    %2 = vector.broadcast %cst_1 : f32 to vector<7x128xf32>
    %c47 = arith.constant 47 : index
    %c0_2 = arith.constant 0 : index
    %3 = vector.load %arg8[%c47, %c0_2] : memref<54x128xf32, #tpu.memory_space<vmem>>, vector<7x128xf32>
    tpu.vector_store %arg8[%c47, %c0_2], %2 {strides = array<i32>} : memref<54x128xf32, #tpu.memory_space<vmem>>, vector<7x128xf32>,
    %c8_i32 = arith.constant 8 : i32
    %4 = arith.muli %arg1, %c8_i32 : i32
    %5 = tpu.assume_multiple %4, 8 : i32
    %c0_3 = arith.constant 0 : index
    %6 = arith.index_cast %5 : i32 to index
    %c0_4 = arith.constant 0 : index
    %7 = vector.load %arg2[%c0_3, %6, %c0_4] : memref<1x40x128xf32, #tpu.memory_space<vmem>>, vector<1x40x128xf32>
    %8 = vector.shape_cast %7 : vector<1x40x128xf32> to vector<40x128xf32>
    %c7 = arith.constant 7 : index
    %c0_5 = arith.constant 0 : index
    %9 = vector.load %arg8[%c7, %c0_5] : memref<54x128xf32, #tpu.memory_space<vmem>>, vector<40x128xf32>
    tpu.vector_store %arg8[%c7, %c0_5], %8 {strides = array<i32>} : memref<54x128xf32, #tpu.memory_space<vmem>>, vector<40x128xf32>,
    %c0_6 = arith.constant 0 : index
    %c7_7 = arith.constant 7 : index
    %c0_8 = arith.constant 0 : index
    %10 = vector.load %arg3[%c0_6, %c7_7, %c0_8] : memref<4x15x128xf32, #tpu.memory_space<vmem>>, vector<1x1x128xf32>
    %11 = vector.shape_cast %10 : vector<1x1x128xf32> to vector<1x128xf32>
    %12 = vector.broadcast %11 : vector<1x128xf32> to vector<40x128xf32>
    %13 = arith.mulf %8, %12 : vector<40x128xf32>
    %c6 = arith.constant 6 : index
    %c0_9 = arith.constant 0 : index
    %14 = vector.load %arg8[%c6, %c0_9] : memref<54x128xf32, #tpu.memory_space<vmem>>, vector<40x128xf32>
    %c0_10 = arith.constant 0 : index
    %c6_11 = arith.constant 6 : index
    %c0_12 = arith.constant 0 : index
    %15 = vector.load %arg3[%c0_10, %c6_11, %c0_12] : memref<4x15x128xf32, #tpu.memory_space<vmem>>, vector<1x1x128xf32>
    %16 = vector.shape_cast %15 : vector<1x1x128xf32> to vector<1x128xf32>
    %17 = vector.broadcast %16 : vector<1x128xf32> to vector<40x128xf32>
    %18 = arith.mulf %14, %17 : vector<40x128xf32>
    %19 = arith.addf %13, %18 : vector<40x128xf32>
    %c8 = arith.constant 8 : index
    %c0_13 = arith.constant 0 : index
    %20 = vector.load %arg8[%c8, %c0_13] : memref<54x128xf32, #tpu.memory_space<vmem>>, vector<40x128xf32>
    %c0_14 = arith.constant 0 : index
    %c8_15 = arith.constant 8 : index
    %c0_16 = arith.constant 0 : index
    %21 = vector.load %arg3[%c0_14, %c8_15, %c0_16] : memref<4x15x128xf32, #tpu.memory_space<vmem>>, vector<1x1x128xf32>
    %22 = vector.shape_cast %21 : vector<1x1x128xf32> to vector<1x128xf32>
    %23 = vector.broadcast %22 : vector<1x128xf32> to vector<40x128xf32>
    %24 = arith.mulf %20, %23 : vector<40x128xf32>
    %25 = arith.addf %19, %24 : vector<40x128xf32>
    %c0_17 = arith.constant 0 : index
    %c0_18 = arith.constant 0 : index
    %26 = vector.load %arg4[%c0_17, %c0_18] : memref<4x128xf32, #tpu.memory_space<vmem>>, vector<1x128xf32>
    %27 = vector.broadcast %26 : vector<1x128xf32> to vector<40x128xf32>
    %28 = arith.addf %25, %27 : vector<40x128xf32>
    %cst_19 = arith.constant 0.000000e+00 : f32
    %29 = vector.broadcast %cst_19 : f32 to vector<40x128xf32>
    %30 = arith.maximumf %28, %29 : vector<40x128xf32>
    %c7_20 = arith.constant 7 : index
    %c0_21 = arith.constant 0 : index
    %31 = vector.load %arg8[%c7_20, %c0_21] : memref<54x128xf32, #tpu.memory_space<vmem>>, vector<40x128xf32>
    tpu.vector_store %arg8[%c7_20, %c0_21], %30 {strides = array<i32>} : memref<54x128xf32, #tpu.memory_space<vmem>>, vector<40x128xf32>,
    %c0_i32 = arith.constant 0 : i32
    %32 = arith.cmpi eq, %arg1, %c0_i32 : i32
    %33 = arith.extui %32 : i1 to i32
    %c0_i32_22 = arith.constant 0 : i32
    %34 = arith.cmpi ne, %33, %c0_i32_22 : i32
    scf.if %34 {
      %cst_202 = arith.constant 0.000000e+00 : f32
      %272 = vector.broadcast %cst_202 : f32 to vector<16x128xf32>
      %c7_203 = arith.constant 7 : index
      %c0_204 = arith.constant 0 : index
      %273 = vector.load %arg8[%c7_203, %c0_204] : memref<54x128xf32, #tpu.memory_space<vmem>>, vector<16x128xf32>
      tpu.vector_store %arg8[%c7_203, %c0_204], %272 {strides = array<i32>} : memref<54x128xf32, #tpu.memory_space<vmem>>, vector<16x128xf32>,
    } else {
    }
    %c0_i32_23 = arith.constant 0 : i32
    %35 = arith.cmpi eq, %arg1, %c0_i32_23 : i32
    %36 = arith.extui %35 : i1 to i32
    %c0_i32_24 = arith.constant 0 : i32
    %37 = arith.cmpi ne, %36, %c0_i32_24 : i32
    scf.if %37 {
      %cst_202 = arith.constant 0.000000e+00 : f32
      %272 = vector.broadcast %cst_202 : f32 to vector<16x128xf32>
      %c31 = arith.constant 31 : index
      %c0_203 = arith.constant 0 : index
      %273 = vector.load %arg8[%c31, %c0_203] : memref<54x128xf32, #tpu.memory_space<vmem>>, vector<16x128xf32>
      tpu.vector_store %arg8[%c31, %c0_203], %272 {strides = array<i32>} : memref<54x128xf32, #tpu.memory_space<vmem>>, vector<16x128xf32>,
    } else {
    }
    %c1 = arith.constant 1 : index
    %c7_25 = arith.constant 7 : index
    %c0_26 = arith.constant 0 : index
    %38 = vector.load %arg3[%c1, %c7_25, %c0_26] : memref<4x15x128xf32, #tpu.memory_space<vmem>>, vector<1x1x128xf32>
    %39 = vector.shape_cast %38 : vector<1x1x128xf32> to vector<1x128xf32>
    %40 = vector.broadcast %39 : vector<1x128xf32> to vector<40x128xf32>
    %41 = arith.mulf %30, %40 : vector<40x128xf32>
    %c4 = arith.constant 4 : index
    %c0_27 = arith.constant 0 : index
    %42 = vector.load %arg8[%c4, %c0_27] : memref<54x128xf32, #tpu.memory_space<vmem>>, vector<40x128xf32>
    %c1_28 = arith.constant 1 : index
    %c4_29 = arith.constant 4 : index
    %c0_30 = arith.constant 0 : index
    %43 = vector.load %arg3[%c1_28, %c4_29, %c0_30] : memref<4x15x128xf32, #tpu.memory_space<vmem>>, vector<1x1x128xf32>
    %44 = vector.shape_cast %43 : vector<1x1x128xf32> to vector<1x128xf32>
    %45 = vector.broadcast %44 : vector<1x128xf32> to vector<40x128xf32>
    %46 = arith.mulf %42, %45 : vector<40x128xf32>
    %47 = arith.addf %41, %46 : vector<40x128xf32>
    %c5 = arith.constant 5 : index
    %c0_31 = arith.constant 0 : index
    %48 = vector.load %arg8[%c5, %c0_31] : memref<54x128xf32, #tpu.memory_space<vmem>>, vector<40x128xf32>
    %c1_32 = arith.constant 1 : index
    %c5_33 = arith.constant 5 : index
    %c0_34 = arith.constant 0 : index
    %49 = vector.load %arg3[%c1_32, %c5_33, %c0_34] : memref<4x15x128xf32, #tpu.memory_space<vmem>>, vector<1x1x128xf32>
    %50 = vector.shape_cast %49 : vector<1x1x128xf32> to vector<1x128xf32>
    %51 = vector.broadcast %50 : vector<1x128xf32> to vector<40x128xf32>
    %52 = arith.mulf %48, %51 : vector<40x128xf32>
    %53 = arith.addf %47, %52 : vector<40x128xf32>
    %c6_35 = arith.constant 6 : index
    %c0_36 = arith.constant 0 : index
    %54 = vector.load %arg8[%c6_35, %c0_36] : memref<54x128xf32, #tpu.memory_space<vmem>>, vector<40x128xf32>
    %c1_37 = arith.constant 1 : index
    %c6_38 = arith.constant 6 : index
    %c0_39 = arith.constant 0 : index
    %55 = vector.load %arg3[%c1_37, %c6_38, %c0_39] : memref<4x15x128xf32, #tpu.memory_space<vmem>>, vector<1x1x128xf32>
    %56 = vector.shape_cast %55 : vector<1x1x128xf32> to vector<1x128xf32>
    %57 = vector.broadcast %56 : vector<1x128xf32> to vector<40x128xf32>
    %58 = arith.mulf %54, %57 : vector<40x128xf32>
    %59 = arith.addf %53, %58 : vector<40x128xf32>
    %c8_40 = arith.constant 8 : index
    %c0_41 = arith.constant 0 : index
    %60 = vector.load %arg8[%c8_40, %c0_41] : memref<54x128xf32, #tpu.memory_space<vmem>>, vector<40x128xf32>
    %c1_42 = arith.constant 1 : index
    %c8_43 = arith.constant 8 : index
    %c0_44 = arith.constant 0 : index
    %61 = vector.load %arg3[%c1_42, %c8_43, %c0_44] : memref<4x15x128xf32, #tpu.memory_space<vmem>>, vector<1x1x128xf32>
    %62 = vector.shape_cast %61 : vector<1x1x128xf32> to vector<1x128xf32>
    %63 = vector.broadcast %62 : vector<1x128xf32> to vector<40x128xf32>
    %64 = arith.mulf %60, %63 : vector<40x128xf32>
    %65 = arith.addf %59, %64 : vector<40x128xf32>
    %c9 = arith.constant 9 : index
    %c0_45 = arith.constant 0 : index
    %66 = vector.load %arg8[%c9, %c0_45] : memref<54x128xf32, #tpu.memory_space<vmem>>, vector<40x128xf32>
    %c1_46 = arith.constant 1 : index
    %c9_47 = arith.constant 9 : index
    %c0_48 = arith.constant 0 : index
    %67 = vector.load %arg3[%c1_46, %c9_47, %c0_48] : memref<4x15x128xf32, #tpu.memory_space<vmem>>, vector<1x1x128xf32>
    %68 = vector.shape_cast %67 : vector<1x1x128xf32> to vector<1x128xf32>
    %69 = vector.broadcast %68 : vector<1x128xf32> to vector<40x128xf32>
    %70 = arith.mulf %66, %69 : vector<40x128xf32>
    %71 = arith.addf %65, %70 : vector<40x128xf32>
    %c10 = arith.constant 10 : index
    %c0_49 = arith.constant 0 : index
    %72 = vector.load %arg8[%c10, %c0_49] : memref<54x128xf32, #tpu.memory_space<vmem>>, vector<40x128xf32>
    %c1_50 = arith.constant 1 : index
    %c10_51 = arith.constant 10 : index
    %c0_52 = arith.constant 0 : index
    %73 = vector.load %arg3[%c1_50, %c10_51, %c0_52] : memref<4x15x128xf32, #tpu.memory_space<vmem>>, vector<1x1x128xf32>
    %74 = vector.shape_cast %73 : vector<1x1x128xf32> to vector<1x128xf32>
    %75 = vector.broadcast %74 : vector<1x128xf32> to vector<40x128xf32>
    %76 = arith.mulf %72, %75 : vector<40x128xf32>
    %77 = arith.addf %71, %76 : vector<40x128xf32>
    %c1_53 = arith.constant 1 : index
    %c0_54 = arith.constant 0 : index
    %78 = vector.load %arg4[%c1_53, %c0_54] : memref<4x128xf32, #tpu.memory_space<vmem>>, vector<1x128xf32>
    %79 = vector.broadcast %78 : vector<1x128xf32> to vector<40x128xf32>
    %80 = arith.addf %77, %79 : vector<40x128xf32>
    %cst_55 = arith.constant 0.000000e+00 : f32
    %81 = vector.broadcast %cst_55 : f32 to vector<40x128xf32>
    %82 = arith.maximumf %80, %81 : vector<40x128xf32>
    %83 = arith.addf %30, %82 : vector<40x128xf32>
    %c7_56 = arith.constant 7 : index
    %c0_57 = arith.constant 0 : index
    %84 = vector.load %arg8[%c7_56, %c0_57] : memref<54x128xf32, #tpu.memory_space<vmem>>, vector<40x128xf32>
    tpu.vector_store %arg8[%c7_56, %c0_57], %82 {strides = array<i32>} : memref<54x128xf32, #tpu.memory_space<vmem>>, vector<40x128xf32>,
    %c0_i32_58 = arith.constant 0 : i32
    %85 = arith.cmpi eq, %arg1, %c0_i32_58 : i32
    %86 = arith.extui %85 : i1 to i32
    %c0_i32_59 = arith.constant 0 : i32
    %87 = arith.cmpi ne, %86, %c0_i32_59 : i32
    scf.if %87 {
      %cst_202 = arith.constant 0.000000e+00 : f32
      %272 = vector.broadcast %cst_202 : f32 to vector<16x128xf32>
      %c7_203 = arith.constant 7 : index
      %c0_204 = arith.constant 0 : index
      %273 = vector.load %arg8[%c7_203, %c0_204] : memref<54x128xf32, #tpu.memory_space<vmem>>, vector<16x128xf32>
      tpu.vector_store %arg8[%c7_203, %c0_204], %272 {strides = array<i32>} : memref<54x128xf32, #tpu.memory_space<vmem>>, vector<16x128xf32>,
    } else {
    }
    %c0_i32_60 = arith.constant 0 : i32
    %88 = arith.cmpi eq, %arg1, %c0_i32_60 : i32
    %89 = arith.extui %88 : i1 to i32
    %c0_i32_61 = arith.constant 0 : i32
    %90 = arith.cmpi ne, %89, %c0_i32_61 : i32
    scf.if %90 {
      %cst_202 = arith.constant 0.000000e+00 : f32
      %272 = vector.broadcast %cst_202 : f32 to vector<16x128xf32>
      %c31 = arith.constant 31 : index
      %c0_203 = arith.constant 0 : index
      %273 = vector.load %arg8[%c31, %c0_203] : memref<54x128xf32, #tpu.memory_space<vmem>>, vector<16x128xf32>
      tpu.vector_store %arg8[%c31, %c0_203], %272 {strides = array<i32>} : memref<54x128xf32, #tpu.memory_space<vmem>>, vector<16x128xf32>,
    } else {
    }
    %c2 = arith.constant 2 : index
    %c7_62 = arith.constant 7 : index
    %c0_63 = arith.constant 0 : index
    %91 = vector.load %arg3[%c2, %c7_62, %c0_63] : memref<4x15x128xf32, #tpu.memory_space<vmem>>, vector<1x1x128xf32>
    %92 = vector.shape_cast %91 : vector<1x1x128xf32> to vector<1x128xf32>
    %93 = vector.broadcast %92 : vector<1x128xf32> to vector<40x128xf32>
    %94 = arith.mulf %82, %93 : vector<40x128xf32>
    %c2_64 = arith.constant 2 : index
    %c0_65 = arith.constant 0 : index
    %95 = vector.load %arg8[%c2_64, %c0_65] : memref<54x128xf32, #tpu.memory_space<vmem>>, vector<40x128xf32>
    %c2_66 = arith.constant 2 : index
    %c2_67 = arith.constant 2 : index
    %c0_68 = arith.constant 0 : index
    %96 = vector.load %arg3[%c2_66, %c2_67, %c0_68] : memref<4x15x128xf32, #tpu.memory_space<vmem>>, vector<1x1x128xf32>
    %97 = vector.shape_cast %96 : vector<1x1x128xf32> to vector<1x128xf32>
    %98 = vector.broadcast %97 : vector<1x128xf32> to vector<40x128xf32>
    %99 = arith.mulf %95, %98 : vector<40x128xf32>
    %100 = arith.addf %94, %99 : vector<40x128xf32>
    %c3 = arith.constant 3 : index
    %c0_69 = arith.constant 0 : index
    %101 = vector.load %arg8[%c3, %c0_69] : memref<54x128xf32, #tpu.memory_space<vmem>>, vector<40x128xf32>
    %c2_70 = arith.constant 2 : index
    %c3_71 = arith.constant 3 : index
    %c0_72 = arith.constant 0 : index
    %102 = vector.load %arg3[%c2_70, %c3_71, %c0_72] : memref<4x15x128xf32, #tpu.memory_space<vmem>>, vector<1x1x128xf32>
    %103 = vector.shape_cast %102 : vector<1x1x128xf32> to vector<1x128xf32>
    %104 = vector.broadcast %103 : vector<1x128xf32> to vector<40x128xf32>
    %105 = arith.mulf %101, %104 : vector<40x128xf32>
    %106 = arith.addf %100, %105 : vector<40x128xf32>
    %c4_73 = arith.constant 4 : index
    %c0_74 = arith.constant 0 : index
    %107 = vector.load %arg8[%c4_73, %c0_74] : memref<54x128xf32, #tpu.memory_space<vmem>>, vector<40x128xf32>
    %c2_75 = arith.constant 2 : index
    %c4_76 = arith.constant 4 : index
    %c0_77 = arith.constant 0 : index
    %108 = vector.load %arg3[%c2_75, %c4_76, %c0_77] : memref<4x15x128xf32, #tpu.memory_space<vmem>>, vector<1x1x128xf32>
    %109 = vector.shape_cast %108 : vector<1x1x128xf32> to vector<1x128xf32>
    %110 = vector.broadcast %109 : vector<1x128xf32> to vector<40x128xf32>
    %111 = arith.mulf %107, %110 : vector<40x128xf32>
    %112 = arith.addf %106, %111 : vector<40x128xf32>
    %c5_78 = arith.constant 5 : index
    %c0_79 = arith.constant 0 : index
    %113 = vector.load %arg8[%c5_78, %c0_79] : memref<54x128xf32, #tpu.memory_space<vmem>>, vector<40x128xf32>
    %c2_80 = arith.constant 2 : index
    %c5_81 = arith.constant 5 : index
    %c0_82 = arith.constant 0 : index
    %114 = vector.load %arg3[%c2_80, %c5_81, %c0_82] : memref<4x15x128xf32, #tpu.memory_space<vmem>>, vector<1x1x128xf32>
    %115 = vector.shape_cast %114 : vector<1x1x128xf32> to vector<1x128xf32>
    %116 = vector.broadcast %115 : vector<1x128xf32> to vector<40x128xf32>
    %117 = arith.mulf %113, %116 : vector<40x128xf32>
    %118 = arith.addf %112, %117 : vector<40x128xf32>
    %c6_83 = arith.constant 6 : index
    %c0_84 = arith.constant 0 : index
    %119 = vector.load %arg8[%c6_83, %c0_84] : memref<54x128xf32, #tpu.memory_space<vmem>>, vector<40x128xf32>
    %c2_85 = arith.constant 2 : index
    %c6_86 = arith.constant 6 : index
    %c0_87 = arith.constant 0 : index
    %120 = vector.load %arg3[%c2_85, %c6_86, %c0_87] : memref<4x15x128xf32, #tpu.memory_space<vmem>>, vector<1x1x128xf32>
    %121 = vector.shape_cast %120 : vector<1x1x128xf32> to vector<1x128xf32>
    %122 = vector.broadcast %121 : vector<1x128xf32> to vector<40x128xf32>
    %123 = arith.mulf %119, %122 : vector<40x128xf32>
    %124 = arith.addf %118, %123 : vector<40x128xf32>
    %c8_88 = arith.constant 8 : index
    %c0_89 = arith.constant 0 : index
    %125 = vector.load %arg8[%c8_88, %c0_89] : memref<54x128xf32, #tpu.memory_space<vmem>>, vector<40x128xf32>
    %c2_90 = arith.constant 2 : index
    %c8_91 = arith.constant 8 : index
    %c0_92 = arith.constant 0 : index
    %126 = vector.load %arg3[%c2_90, %c8_91, %c0_92] : memref<4x15x128xf32, #tpu.memory_space<vmem>>, vector<1x1x128xf32>
    %127 = vector.shape_cast %126 : vector<1x1x128xf32> to vector<1x128xf32>
    %128 = vector.broadcast %127 : vector<1x128xf32> to vector<40x128xf32>
    %129 = arith.mulf %125, %128 : vector<40x128xf32>
    %130 = arith.addf %124, %129 : vector<40x128xf32>
    %c9_93 = arith.constant 9 : index
    %c0_94 = arith.constant 0 : index
    %131 = vector.load %arg8[%c9_93, %c0_94] : memref<54x128xf32, #tpu.memory_space<vmem>>, vector<40x128xf32>
    %c2_95 = arith.constant 2 : index
    %c9_96 = arith.constant 9 : index
    %c0_97 = arith.constant 0 : index
    %132 = vector.load %arg3[%c2_95, %c9_96, %c0_97] : memref<4x15x128xf32, #tpu.memory_space<vmem>>, vector<1x1x128xf32>
    %133 = vector.shape_cast %132 : vector<1x1x128xf32> to vector<1x128xf32>
    %134 = vector.broadcast %133 : vector<1x128xf32> to vector<40x128xf32>
    %135 = arith.mulf %131, %134 : vector<40x128xf32>
    %136 = arith.addf %130, %135 : vector<40x128xf32>
    %c10_98 = arith.constant 10 : index
    %c0_99 = arith.constant 0 : index
    %137 = vector.load %arg8[%c10_98, %c0_99] : memref<54x128xf32, #tpu.memory_space<vmem>>, vector<40x128xf32>
    %c2_100 = arith.constant 2 : index
    %c10_101 = arith.constant 10 : index
    %c0_102 = arith.constant 0 : index
    %138 = vector.load %arg3[%c2_100, %c10_101, %c0_102] : memref<4x15x128xf32, #tpu.memory_space<vmem>>, vector<1x1x128xf32>
    %139 = vector.shape_cast %138 : vector<1x1x128xf32> to vector<1x128xf32>
    %140 = vector.broadcast %139 : vector<1x128xf32> to vector<40x128xf32>
    %141 = arith.mulf %137, %140 : vector<40x128xf32>
    %142 = arith.addf %136, %141 : vector<40x128xf32>
    %c11 = arith.constant 11 : index
    %c0_103 = arith.constant 0 : index
    %143 = vector.load %arg8[%c11, %c0_103] : memref<54x128xf32, #tpu.memory_space<vmem>>, vector<40x128xf32>
    %c2_104 = arith.constant 2 : index
    %c11_105 = arith.constant 11 : index
    %c0_106 = arith.constant 0 : index
    %144 = vector.load %arg3[%c2_104, %c11_105, %c0_106] : memref<4x15x128xf32, #tpu.memory_space<vmem>>, vector<1x1x128xf32>
    %145 = vector.shape_cast %144 : vector<1x1x128xf32> to vector<1x128xf32>
    %146 = vector.broadcast %145 : vector<1x128xf32> to vector<40x128xf32>
    %147 = arith.mulf %143, %146 : vector<40x128xf32>
    %148 = arith.addf %142, %147 : vector<40x128xf32>
    %c12 = arith.constant 12 : index
    %c0_107 = arith.constant 0 : index
    %149 = vector.load %arg8[%c12, %c0_107] : memref<54x128xf32, #tpu.memory_space<vmem>>, vector<40x128xf32>
    %c2_108 = arith.constant 2 : index
    %c12_109 = arith.constant 12 : index
    %c0_110 = arith.constant 0 : index
    %150 = vector.load %arg3[%c2_108, %c12_109, %c0_110] : memref<4x15x128xf32, #tpu.memory_space<vmem>>, vector<1x1x128xf32>
    %151 = vector.shape_cast %150 : vector<1x1x128xf32> to vector<1x128xf32>
    %152 = vector.broadcast %151 : vector<1x128xf32> to vector<40x128xf32>
    %153 = arith.mulf %149, %152 : vector<40x128xf32>
    %154 = arith.addf %148, %153 : vector<40x128xf32>
    %c2_111 = arith.constant 2 : index
    %c0_112 = arith.constant 0 : index
    %155 = vector.load %arg4[%c2_111, %c0_112] : memref<4x128xf32, #tpu.memory_space<vmem>>, vector<1x128xf32>
    %156 = vector.broadcast %155 : vector<1x128xf32> to vector<40x128xf32>
    %157 = arith.addf %154, %156 : vector<40x128xf32>
    %cst_113 = arith.constant 0.000000e+00 : f32
    %158 = vector.broadcast %cst_113 : f32 to vector<40x128xf32>
    %159 = arith.maximumf %157, %158 : vector<40x128xf32>
    %160 = arith.addf %83, %159 : vector<40x128xf32>
    %c7_114 = arith.constant 7 : index
    %c0_115 = arith.constant 0 : index
    %161 = vector.load %arg8[%c7_114, %c0_115] : memref<54x128xf32, #tpu.memory_space<vmem>>, vector<40x128xf32>
    tpu.vector_store %arg8[%c7_114, %c0_115], %159 {strides = array<i32>} : memref<54x128xf32, #tpu.memory_space<vmem>>, vector<40x128xf32>,
    %c0_i32_116 = arith.constant 0 : i32
    %162 = arith.cmpi eq, %arg1, %c0_i32_116 : i32
    %163 = arith.extui %162 : i1 to i32
    %c0_i32_117 = arith.constant 0 : i32
    %164 = arith.cmpi ne, %163, %c0_i32_117 : i32
    scf.if %164 {
      %cst_202 = arith.constant 0.000000e+00 : f32
      %272 = vector.broadcast %cst_202 : f32 to vector<16x128xf32>
      %c7_203 = arith.constant 7 : index
      %c0_204 = arith.constant 0 : index
      %273 = vector.load %arg8[%c7_203, %c0_204] : memref<54x128xf32, #tpu.memory_space<vmem>>, vector<16x128xf32>
      tpu.vector_store %arg8[%c7_203, %c0_204], %272 {strides = array<i32>} : memref<54x128xf32, #tpu.memory_space<vmem>>, vector<16x128xf32>,
    } else {
    }
    %c0_i32_118 = arith.constant 0 : i32
    %165 = arith.cmpi eq, %arg1, %c0_i32_118 : i32
    %166 = arith.extui %165 : i1 to i32
    %c0_i32_119 = arith.constant 0 : i32
    %167 = arith.cmpi ne, %166, %c0_i32_119 : i32
    scf.if %167 {
      %cst_202 = arith.constant 0.000000e+00 : f32
      %272 = vector.broadcast %cst_202 : f32 to vector<16x128xf32>
      %c31 = arith.constant 31 : index
      %c0_203 = arith.constant 0 : index
      %273 = vector.load %arg8[%c31, %c0_203] : memref<54x128xf32, #tpu.memory_space<vmem>>, vector<16x128xf32>
      tpu.vector_store %arg8[%c31, %c0_203], %272 {strides = array<i32>} : memref<54x128xf32, #tpu.memory_space<vmem>>, vector<16x128xf32>,
    } else {
    }
    %c3_120 = arith.constant 3 : index
    %c7_121 = arith.constant 7 : index
    %c0_122 = arith.constant 0 : index
    %168 = vector.load %arg3[%c3_120, %c7_121, %c0_122] : memref<4x15x128xf32, #tpu.memory_space<vmem>>, vector<1x1x128xf32>
    %169 = vector.shape_cast %168 : vector<1x1x128xf32> to vector<1x128xf32>
    %170 = vector.broadcast %169 : vector<1x128xf32> to vector<40x128xf32>
    %171 = arith.mulf %159, %170 : vector<40x128xf32>
    %c0_123 = arith.constant 0 : index
    %c0_124 = arith.constant 0 : index
    %172 = vector.load %arg8[%c0_123, %c0_124] : memref<54x128xf32, #tpu.memory_space<vmem>>, vector<40x128xf32>
    %c3_125 = arith.constant 3 : index
    %c0_126 = arith.constant 0 : index
    %c0_127 = arith.constant 0 : index
    %173 = vector.load %arg3[%c3_125, %c0_126, %c0_127] : memref<4x15x128xf32, #tpu.memory_space<vmem>>, vector<1x1x128xf32>
    %174 = vector.shape_cast %173 : vector<1x1x128xf32> to vector<1x128xf32>
    %175 = vector.broadcast %174 : vector<1x128xf32> to vector<40x128xf32>
    %176 = arith.mulf %172, %175 : vector<40x128xf32>
    %177 = arith.addf %171, %176 : vector<40x128xf32>
    %c1_128 = arith.constant 1 : index
    %c0_129 = arith.constant 0 : index
    %178 = vector.load %arg8[%c1_128, %c0_129] : memref<54x128xf32, #tpu.memory_space<vmem>>, vector<40x128xf32>
    %c3_130 = arith.constant 3 : index
    %c1_131 = arith.constant 1 : index
    %c0_132 = arith.constant 0 : index
    %179 = vector.load %arg3[%c3_130, %c1_131, %c0_132] : memref<4x15x128xf32, #tpu.memory_space<vmem>>, vector<1x1x128xf32>
    %180 = vector.shape_cast %179 : vector<1x1x128xf32> to vector<1x128xf32>
    %181 = vector.broadcast %180 : vector<1x128xf32> to vector<40x128xf32>
    %182 = arith.mulf %178, %181 : vector<40x128xf32>
    %183 = arith.addf %177, %182 : vector<40x128xf32>
    %c2_133 = arith.constant 2 : index
    %c0_134 = arith.constant 0 : index
    %184 = vector.load %arg8[%c2_133, %c0_134] : memref<54x128xf32, #tpu.memory_space<vmem>>, vector<40x128xf32>
    %c3_135 = arith.constant 3 : index
    %c2_136 = arith.constant 2 : index
    %c0_137 = arith.constant 0 : index
    %185 = vector.load %arg3[%c3_135, %c2_136, %c0_137] : memref<4x15x128xf32, #tpu.memory_space<vmem>>, vector<1x1x128xf32>
    %186 = vector.shape_cast %185 : vector<1x1x128xf32> to vector<1x128xf32>
    %187 = vector.broadcast %186 : vector<1x128xf32> to vector<40x128xf32>
    %188 = arith.mulf %184, %187 : vector<40x128xf32>
    %189 = arith.addf %183, %188 : vector<40x128xf32>
    %c3_138 = arith.constant 3 : index
    %c0_139 = arith.constant 0 : index
    %190 = vector.load %arg8[%c3_138, %c0_139] : memref<54x128xf32, #tpu.memory_space<vmem>>, vector<40x128xf32>
    %c3_140 = arith.constant 3 : index
    %c3_141 = arith.constant 3 : index
    %c0_142 = arith.constant 0 : index
    %191 = vector.load %arg3[%c3_140, %c3_141, %c0_142] : memref<4x15x128xf32, #tpu.memory_space<vmem>>, vector<1x1x128xf32>
    %192 = vector.shape_cast %191 : vector<1x1x128xf32> to vector<1x128xf32>
    %193 = vector.broadcast %192 : vector<1x128xf32> to vector<40x128xf32>
    %194 = arith.mulf %190, %193 : vector<40x128xf32>
    %195 = arith.addf %189, %194 : vector<40x128xf32>
    %c4_143 = arith.constant 4 : index
    %c0_144 = arith.constant 0 : index
    %196 = vector.load %arg8[%c4_143, %c0_144] : memref<54x128xf32, #tpu.memory_space<vmem>>, vector<40x128xf32>
    %c3_145 = arith.constant 3 : index
    %c4_146 = arith.constant 4 : index
    %c0_147 = arith.constant 0 : index
    %197 = vector.load %arg3[%c3_145, %c4_146, %c0_147] : memref<4x15x128xf32, #tpu.memory_space<vmem>>, vector<1x1x128xf32>
    %198 = vector.shape_cast %197 : vector<1x1x128xf32> to vector<1x128xf32>
    %199 = vector.broadcast %198 : vector<1x128xf32> to vector<40x128xf32>
    %200 = arith.mulf %196, %199 : vector<40x128xf32>
    %201 = arith.addf %195, %200 : vector<40x128xf32>
    %c5_148 = arith.constant 5 : index
    %c0_149 = arith.constant 0 : index
    %202 = vector.load %arg8[%c5_148, %c0_149] : memref<54x128xf32, #tpu.memory_space<vmem>>, vector<40x128xf32>
    %c3_150 = arith.constant 3 : index
    %c5_151 = arith.constant 5 : index
    %c0_152 = arith.constant 0 : index
    %203 = vector.load %arg3[%c3_150, %c5_151, %c0_152] : memref<4x15x128xf32, #tpu.memory_space<vmem>>, vector<1x1x128xf32>
    %204 = vector.shape_cast %203 : vector<1x1x128xf32> to vector<1x128xf32>
    %205 = vector.broadcast %204 : vector<1x128xf32> to vector<40x128xf32>
    %206 = arith.mulf %202, %205 : vector<40x128xf32>
    %207 = arith.addf %201, %206 : vector<40x128xf32>
    %c6_153 = arith.constant 6 : index
    %c0_154 = arith.constant 0 : index
    %208 = vector.load %arg8[%c6_153, %c0_154] : memref<54x128xf32, #tpu.memory_space<vmem>>, vector<40x128xf32>
    %c3_155 = arith.constant 3 : index
    %c6_156 = arith.constant 6 : index
    %c0_157 = arith.constant 0 : index
    %209 = vector.load %arg3[%c3_155, %c6_156, %c0_157] : memref<4x15x128xf32, #tpu.memory_space<vmem>>, vector<1x1x128xf32>
    %210 = vector.shape_cast %209 : vector<1x1x128xf32> to vector<1x128xf32>
    %211 = vector.broadcast %210 : vector<1x128xf32> to vector<40x128xf32>
    %212 = arith.mulf %208, %211 : vector<40x128xf32>
    %213 = arith.addf %207, %212 : vector<40x128xf32>
    %c8_158 = arith.constant 8 : index
    %c0_159 = arith.constant 0 : index
    %214 = vector.load %arg8[%c8_158, %c0_159] : memref<54x128xf32, #tpu.memory_space<vmem>>, vector<40x128xf32>
    %c3_160 = arith.constant 3 : index
    %c8_161 = arith.constant 8 : index
    %c0_162 = arith.constant 0 : index
    %215 = vector.load %arg3[%c3_160, %c8_161, %c0_162] : memref<4x15x128xf32, #tpu.memory_space<vmem>>, vector<1x1x128xf32>
    %216 = vector.shape_cast %215 : vector<1x1x128xf32> to vector<1x128xf32>
    %217 = vector.broadcast %216 : vector<1x128xf32> to vector<40x128xf32>
    %218 = arith.mulf %214, %217 : vector<40x128xf32>
    %219 = arith.addf %213, %218 : vector<40x128xf32>
    %c9_163 = arith.constant 9 : index
    %c0_164 = arith.constant 0 : index
    %220 = vector.load %arg8[%c9_163, %c0_164] : memref<54x128xf32, #tpu.memory_space<vmem>>, vector<40x128xf32>
    %c3_165 = arith.constant 3 : index
    %c9_166 = arith.constant 9 : index
    %c0_167 = arith.constant 0 : index
    %221 = vector.load %arg3[%c3_165, %c9_166, %c0_167] : memref<4x15x128xf32, #tpu.memory_space<vmem>>, vector<1x1x128xf32>
    %222 = vector.shape_cast %221 : vector<1x1x128xf32> to vector<1x128xf32>
    %223 = vector.broadcast %222 : vector<1x128xf32> to vector<40x128xf32>
    %224 = arith.mulf %220, %223 : vector<40x128xf32>
    %225 = arith.addf %219, %224 : vector<40x128xf32>
    %c10_168 = arith.constant 10 : index
    %c0_169 = arith.constant 0 : index
    %226 = vector.load %arg8[%c10_168, %c0_169] : memref<54x128xf32, #tpu.memory_space<vmem>>, vector<40x128xf32>
    %c3_170 = arith.constant 3 : index
    %c10_171 = arith.constant 10 : index
    %c0_172 = arith.constant 0 : index
    %227 = vector.load %arg3[%c3_170, %c10_171, %c0_172] : memref<4x15x128xf32, #tpu.memory_space<vmem>>, vector<1x1x128xf32>
    %228 = vector.shape_cast %227 : vector<1x1x128xf32> to vector<1x128xf32>
    %229 = vector.broadcast %228 : vector<1x128xf32> to vector<40x128xf32>
    %230 = arith.mulf %226, %229 : vector<40x128xf32>
    %231 = arith.addf %225, %230 : vector<40x128xf32>
    %c11_173 = arith.constant 11 : index
    %c0_174 = arith.constant 0 : index
    %232 = vector.load %arg8[%c11_173, %c0_174] : memref<54x128xf32, #tpu.memory_space<vmem>>, vector<40x128xf32>
    %c3_175 = arith.constant 3 : index
    %c11_176 = arith.constant 11 : index
    %c0_177 = arith.constant 0 : index
    %233 = vector.load %arg3[%c3_175, %c11_176, %c0_177] : memref<4x15x128xf32, #tpu.memory_space<vmem>>, vector<1x1x128xf32>
    %234 = vector.shape_cast %233 : vector<1x1x128xf32> to vector<1x128xf32>
    %235 = vector.broadcast %234 : vector<1x128xf32> to vector<40x128xf32>
    %236 = arith.mulf %232, %235 : vector<40x128xf32>
    %237 = arith.addf %231, %236 : vector<40x128xf32>
    %c12_178 = arith.constant 12 : index
    %c0_179 = arith.constant 0 : index
    %238 = vector.load %arg8[%c12_178, %c0_179] : memref<54x128xf32, #tpu.memory_space<vmem>>, vector<40x128xf32>
    %c3_180 = arith.constant 3 : index
    %c12_181 = arith.constant 12 : index
    %c0_182 = arith.constant 0 : index
    %239 = vector.load %arg3[%c3_180, %c12_181, %c0_182] : memref<4x15x128xf32, #tpu.memory_space<vmem>>, vector<1x1x128xf32>
    %240 = vector.shape_cast %239 : vector<1x1x128xf32> to vector<1x128xf32>
    %241 = vector.broadcast %240 : vector<1x128xf32> to vector<40x128xf32>
    %242 = arith.mulf %238, %241 : vector<40x128xf32>
    %243 = arith.addf %237, %242 : vector<40x128xf32>
    %c13 = arith.constant 13 : index
    %c0_183 = arith.constant 0 : index
    %244 = vector.load %arg8[%c13, %c0_183] : memref<54x128xf32, #tpu.memory_space<vmem>>, vector<40x128xf32>
    %c3_184 = arith.constant 3 : index
    %c13_185 = arith.constant 13 : index
    %c0_186 = arith.constant 0 : index
    %245 = vector.load %arg3[%c3_184, %c13_185, %c0_186] : memref<4x15x128xf32, #tpu.memory_space<vmem>>, vector<1x1x128xf32>
    %246 = vector.shape_cast %245 : vector<1x1x128xf32> to vector<1x128xf32>
    %247 = vector.broadcast %246 : vector<1x128xf32> to vector<40x128xf32>
    %248 = arith.mulf %244, %247 : vector<40x128xf32>
    %249 = arith.addf %243, %248 : vector<40x128xf32>
    %c14 = arith.constant 14 : index
    %c0_187 = arith.constant 0 : index
    %250 = vector.load %arg8[%c14, %c0_187] : memref<54x128xf32, #tpu.memory_space<vmem>>, vector<40x128xf32>
    %c3_188 = arith.constant 3 : index
    %c14_189 = arith.constant 14 : index
    %c0_190 = arith.constant 0 : index
    %251 = vector.load %arg3[%c3_188, %c14_189, %c0_190] : memref<4x15x128xf32, #tpu.memory_space<vmem>>, vector<1x1x128xf32>
    %252 = vector.shape_cast %251 : vector<1x1x128xf32> to vector<1x128xf32>
    %253 = vector.broadcast %252 : vector<1x128xf32> to vector<40x128xf32>
    %254 = arith.mulf %250, %253 : vector<40x128xf32>
    %255 = arith.addf %249, %254 : vector<40x128xf32>
    %c3_191 = arith.constant 3 : index
    %c0_192 = arith.constant 0 : index
    %256 = vector.load %arg4[%c3_191, %c0_192] : memref<4x128xf32, #tpu.memory_space<vmem>>, vector<1x128xf32>
    %257 = vector.broadcast %256 : vector<1x128xf32> to vector<40x128xf32>
    %258 = arith.addf %255, %257 : vector<40x128xf32>
    %cst_193 = arith.constant 0.000000e+00 : f32
    %259 = vector.broadcast %cst_193 : f32 to vector<40x128xf32>
    %260 = arith.maximumf %258, %259 : vector<40x128xf32>
    %261 = arith.addf %160, %260 : vector<40x128xf32>
    %262 = vector.extract_strided_slice %261 {offsets = [16, 0], sizes = [8, 128], strides = [1, 1]} : vector<40x128xf32> to vector<8x128xf32>
    %263 = arith.truncf %262 : vector<8x128xf32> to vector<8x128xbf16>
    %c0_194 = arith.constant 0 : index
    %c0_195 = arith.constant 0 : index
    %264 = vector.load %arg5[%c0_194, %c0_195] : memref<128x128xbf16, #tpu.memory_space<vmem>>, vector<128x128xbf16>
    %cst_196 = arith.constant dense<0.000000e+00> : vector<8x128xf32>
    %265 = tpu.matmul %263, %264, %cst_196 {dimension_numbers = #tpu.dot_dimension_numbers<[1], [0], [0], [1], [0, 0, 1, 1], [], []>} : vector<8x128xbf16>, vector<128x128xbf16>, vector<8x128xf32> -> vector<8x128xf32>
    %c0_197 = arith.constant 0 : index
    %c0_198 = arith.constant 0 : index
    %266 = vector.load %arg6[%c0_197, %c0_198] : memref<1x128xf32, #tpu.memory_space<vmem>>, vector<1x128xf32>
    %267 = vector.broadcast %266 : vector<1x128xf32> to vector<8x128xf32>
    %268 = arith.addf %265, %267 : vector<8x128xf32>
    %c0_199 = arith.constant 0 : index
    %c0_200 = arith.constant 0 : index
    %c0_201 = arith.constant 0 : index
    %269 = vector.load %arg7[%c0_199, %c0_200, %c0_201] : memref<1x8x128xf32, #tpu.memory_space<vmem>>, vector<1x8x128xf32>
    %270 = vector.shape_cast %269 : vector<1x8x128xf32> to vector<8x128xf32>
    %271 = vector.shape_cast %268 : vector<8x128xf32> to vector<1x8x128xf32>
    tpu.vector_store %arg7[%c0_199, %c0_200, %c0_201], %271 {strides = array<i32>} : memref<1x8x128xf32, #tpu.memory_space<vmem>>, vector<1x8x128xf32>,
    return
  }
  func.func @transform_0(%arg0: i32, %arg1: i32) -> (i32, i32, i32) {
    %c0_i32 = arith.constant 0 : i32
    %c0_i32_0 = arith.constant 0 : i32
    %c0_i32_1 = arith.constant 0 : i32
    return %arg0, %c0_i32, %c0_i32_0 : i32, i32, i32
  }
  func.func @transform_1(%arg0: i32, %arg1: i32) -> (i32, i32, i32) {
    %c0_i32 = arith.constant 0 : i32
    %c0_i32_0 = arith.constant 0 : i32
    %c0_i32_1 = arith.constant 0 : i32
    %c0_i32_2 = arith.constant 0 : i32
    return %c0_i32, %c0_i32_0, %c0_i32_1 : i32, i32, i32
  }
  func.func @transform_2(%arg0: i32, %arg1: i32) -> (i32, i32) {
    %c0_i32 = arith.constant 0 : i32
    %c0_i32_0 = arith.constant 0 : i32
    %c0_i32_1 = arith.constant 0 : i32
    return %c0_i32, %c0_i32_0 : i32, i32
  }
  func.func @transform_3(%arg0: i32, %arg1: i32) -> (i32, i32) {
    %c0_i32 = arith.constant 0 : i32
    %c0_i32_0 = arith.constant 0 : i32
    %c0_i32_1 = arith.constant 0 : i32
    return %c0_i32, %c0_i32_0 : i32, i32
  }
  func.func @transform_4(%arg0: i32, %arg1: i32) -> (i32, i32) {
    %c0_i32 = arith.constant 0 : i32
    %c0_i32_0 = arith.constant 0 : i32
    %c0_i32_1 = arith.constant 0 : i32
    return %c0_i32, %c0_i32_0 : i32, i32
  }
  func.func @transform_5(%arg0: i32, %arg1: i32) -> (i32, i32, i32) {
    %c0_i32 = arith.constant 0 : i32
    %c0_i32_0 = arith.constant 0 : i32
    return %arg0, %arg1, %c0_i32 : i32, i32, i32
  }
}

</mosaic_0001>

<bundles_post_ra>
// kernel: tpu_custom_call.1
= control target key start
LH: loop header
LB: loop body
LE: loop exit
PB: predicated region body
PF: predicated region fallthrough
CT: control target
= control target key end

     0   :  { %10 = vsyncpa [#allocation4], 0  ;;  %s1688_s0 = inlined_call_operand.vmem [shape: f32[2,40,128], index: 0, kind: input, shape index: {}]   ;;  %s1689_s1 = inlined_call_operand.vmem [shape: f32[4,15,128], index: 1, kind: input, shape index: {}]   ;;  %s1690_s2 = inlined_call_operand.vmem [shape: f32[4,128], index: 2, kind: input, shape index: {}]   ;;  %s1691_s3 = inlined_call_operand.hbm [shape: bf16[128,128], index: 3, kind: input, shape index: {}]   ;;  %s1692_s4 = inlined_call_operand.vmem [shape: f32[1,128], index: 4, kind: input, shape index: {}]   ;;  %s1693_s5 = inlined_call_operand.hbm [shape: f32[2,8,128], index: 5, kind: output, shape index: {}]  }
   0x1   :  { %11 = vsyncpa [#allocation5], 0 }
   0x2   :  { %13 = vsyncpa [#allocation5 + $0x1], 0  ;;  %s1415_s18 = smov 0   ;;  %s1417_s19 = smov 0  }
   0x3   :  { %s1419_s20 = smov 0   ;;  %s1421_s21 = smov 0  }
   0x4   :  { %s1423_s22 = smov 0   ;;  %s1425_s23 = smov 0  }
   0x5 LB: > { %s1068_s24 = sadd.s32 4294967295, %s1377_s23   ;;  %s1069_s25 = sadd.s32 4294967294, %s1377_s23   ;;  %s1377_s23 = sphi %s1425_s23, %s19_s23   ;;  %s1373_s22 = sphi %s1423_s22, %s1702_s22   ;;  %s1369_s21 = sphi %s1421_s21, %s1701_s21   ;;  %s1365_s20 = sphi %s1419_s20, %s1700_s20   ;;  %s1361_s19 = sphi %s1417_s19, %s1699_s19   ;;  %s1357_s18 = sphi %s1415_s18, %s1698_s18  }
   0x6   : > { %s31_s26 = sadd.s32 1, %s1373_s22  ;;  %s150_s27 = sadd.s32 1, %s1365_s20 }
   0x7   : > { %p33_p0 = scmp.ge.s32.totalorder %s31_s26, 2  ;;  %p160_p1 = scmp.ne.s32.totalorder %s1365_s20, %s1361_s19 }
   0x8   : > { %p161_p2 = scmp.eq.s32.totalorder %s1068_s24, 1  ;;  %p166_p3 = scmp.ne.s32.totalorder %s1361_s19, %s1357_s18 }
   0x9   : > { %s1704_s26 = smov (%p33_p0, %s31_s26), 0  ;;  %p167_p5 = scmp.eq.s32.totalorder %s1069_s25, 1 }
   0xa   : > { %p1455_p4 = por %p161_p2, %p160_p1  ;;  %s145_s29 = ssub.s32 %s1373_s22, %s1704_s26 }
   0xb   : > { %p1070_p6 = scmp.ge.s32.totalorder %s1377_s23, 1  ;;  %p148_p7 = scmp.eq.s32.totalorder %s145_s29, 0 }
   0xc   : > { %p1462_p8 = por %p167_p5, %p166_p3  ;;  %p174_p9 = scmp.lt.s32.totalorder %s1377_s23, 3 }
   0xd   : > { %s1468_s6 = scalar_select %p148_p7, %s1365_s20, %s150_s27  }
   0xe   : > { %p1470_p10 = pnand %p1070_p6, %p174_p9  ;;  %p1474_p11 = scmp.eq.s32.totalorder %s1068_s24, 0 }
   0xf   : > { %s1379_s9 = smov [#allocation3]  }
  0x10   : > { %p1199_p12 = pneg %p1470_p10  ;;  %s192_s10 = sshll.u32 %s1379_s9, 4  ;;  %s193_s10 = int_to_ptr.vmem [resolvable:$true] %s192_s10 }
  0x11   : > { %s1282_s11 = scalar_lea.vmem %s193_s10, 1024  ;;  %p1290_p5 = scmp.lt.s32.totalorder %s193_s10, %s193_s10 }
  0x12   : > { %p1200_p13 = pnand %p1474_p11, %p1199_p12  ;;  %p1283_p1 = scmp.ne.s32.totalorder %s193_s10, %s1282_s11 }
  0x13   : > { %p1291_p6 = scmp.lt.s32.totalorder %s1282_s11, %s1282_s11 }
  0x14   : > { %p1273_p0 = pneg %p1200_p13 }
  0x15   : > { %p1292_p7 = por %p1291_p6, %p1290_p5 }
  0x16   : > { %p1285_p2 = pnand %p1283_p1, %p1273_p0 }
  0x18   : > { %p1286_p3 = pneg %p1285_p2 }
  0x1a   : > { %p1293_p9 = pnand %p1292_p7, %p1286_p3 }
  0x1c   : > { %1296 = shalt.err (!%p1293_p9)
}
  0x1d   : > { %s1380_s12 = smov 64   ;;  %s1381_s13 = smov 4  }
  0x1e   : > { %1202 = dma.hbm_to_vmem [thread:$0]  (!%p1200_p13), %s1691_s3, 1024, %s193_s10, [#allocation4], %s1380_s12, %s1380_s12, %s1381_s13  }
  0x1f   : > { %219 = sbr.rel (%p1470_p10) target bundleno = 378 (0x17a), region = 40 }
  0x24   : > { %1348 = dma.done.wait (%p1474_p11), [#allocation4], 1024  }
  0x25   : > { %1350 = vsyncadd (%p1474_p11), [#allocation4], 4294966272  ;;  %p247_p12 = scmp.lt.s32.totalorder %s1369_s21, 1  ;;  %v1382_v0 = vmov 0.0   ;;  %vm1383_vm0 = vmmov 0   ;;  %v1263_v1 = vld [vmem:[#allocation3 + $0x38] sm:$0xff]  }
  0x26   : > { %1172 = vmatprep.subr.bf16.mxu0 %v1382_v0  ;;  %1188 = vmatprep.mubr.msk.bf16.mxu0 %vm1383_vm0, %v1382_v0  ;;  %v1264_v2 = vld [vmem:[#allocation3 + $0x30] sm:$0xff]   ;;  %v1265_v3 = vld [vmem:[#allocation3 + $0x28] sm:$0xff]   ;;  %v1266_v7 = vld [vmem:[#allocation3 + $0x20] sm:$0xff]   ;;  %s244_s11 = sand.u32 1, %s1361_s19   ;;  %s1160_s15 = sshll.u32 %s1369_s21, 7 }
  0x27   : > { %s248_s16 = scalar_select %p247_p12, %s1369_s21, 1  ;;  %1173 = vmatpush3.bf16.msra.mxu0 %v1263_v1  ;;  %v1077_v8 = vld [vmem:[%s1689_s1 + $0x7] ss:$0 sm:$0xff]  ;;  %v1267_v9 = vld [vmem:[#allocation3 + $0x18] sm:$0xff]   ;;  %v1078_v10 = vld [vmem:[%s1689_s1 + $0x6] ss:$0 sm:$0xff] }
  0x28   : > { %1174 = vmatprep.subr.bf16.mxu0 %v1382_v0  ;;  %v1079_v12 = vld [vmem:[%s1689_s1 + $0x8] ss:$0 sm:$0xff]  ;;  %v1080_v19 = vld [vmem:[%s1690_s2] ss:$0 sm:$0xff]  ;;  %v1270_v24 = vld [vmem:[#allocation3] sm:$0xff]   ;;  %s1075_s12 = sshll.u32 %s244_s11, 3 }
  0x29   : > { %s1192_s17 = smul.u32 40, %s248_s16  ;;  %v1268_v16 = vld [vmem:[#allocation3 + $0x10] sm:$0xff]   ;;  %v1269_v21 = vld [vmem:[#allocation3 + $0x8] sm:$0xff]   ;;  %v1082_v25 = vld [vmem:[%s1689_s1 + $0x17] ss:$0 sm:$0xff]  ;;  %s246_s16 = scalar_lea.vmem [#allocation6], %s1075_s12 }
  0x2a   : > { %v1084_v26 = vld [vmem:[%s1689_s1 + $0x14] ss:$0 sm:$0xff]  ;;  %v1086_v27 = vld [vmem:[%s1689_s1 + $0x15] ss:$0 sm:$0xff]  ;;  %v1088_v29 = vld [vmem:[%s1689_s1 + $0x16] ss:$0 sm:$0xff] }
  0x2b   : > { %s251_s27 = scalar_lea.vmem %s1688_s0, %s1192_s17  ;;  %1175 = vmatpush3.bf16.msra.mxu0 %v1264_v2  ;;  %v1090_v38 = vld [vmem:[%s1689_s1 + $0x18] ss:$0 sm:$0xff]  ;;  %v1092_v41 = vld [vmem:[%s1689_s1 + $0x19] ss:$0 sm:$0xff]  ;;  %v1094_v44 = vld [vmem:[%s1689_s1 + $0x1a] ss:$0 sm:$0xff] }
  0x2c   : > { %1176 = vmatprep.subr.bf16.mxu0 %v1382_v0  ;;  %v258_v4 = vld [vmem:[%s251_s27 + $0x8] sm:$0xff]  ;;  %v259_v5 = vld [vmem:[%s251_s27 + $0x10] sm:$0xff]  ;;  %v260_v6 = vld [vmem:[%s251_s27 + $0x18] sm:$0xff]  ;;  %s986_s17 = sshll.u32 %s246_s16, 4  ;;  %s1642_s27 = scalar_lea.hbm %s1693_s5, %s1160_s15  ;;  %s1644_s17 = int_to_ptr.vmem [resolvable:$true] %s986_s17 }
  0x2d   : > { %263 = vst [vmem:[#allocation2 + $0xf] sm:$0xff] %v258_v4  ;;  %264 = vst [vmem:[#allocation2 + $0x17] sm:$0xff] %v259_v5  ;;  %v274_v11 = vmul.f32 %v1077_v8, %v259_v5  ;;  %v1095_v50 = vld [vmem:[%s1690_s2 + $0x1] ss:$0 sm:$0xff]  ;;  %v1097_v55 = vld [vmem:[%s1689_s1 + $0x27] ss:$0 sm:$0xff] }
  0x2e   : > { %265 = vst [vmem:[#allocation2 + $0x1f] sm:$0xff] %v260_v6  ;;  %v1099_v56 = vld [vmem:[%s1689_s1 + $0x22] ss:$0 sm:$0xff]  ;;  %v1101_v57 = vld [vmem:[%s1689_s1 + $0x23] ss:$0 sm:$0xff]  ;;  %s972_s29 = scalar_lea.sflag [#allocation5], %s244_s11 }
  0x2f   : > { %1177 = vmatpush3.bf16.msra.mxu0 %v1265_v3  ;;  %v1103_v61 = vld [vmem:[%s1689_s1 + $0x24] ss:$0 sm:$0xff]  ;;  %v1105_v3 = vld [vmem:[%s1689_s1 + $0x25] ss:$0 sm:$0xff]  ;;  %s1297_s7 = scalar_lea.vmem %s1644_s17, 128  ;;  %s1384_s21 = smov [#allocation6]  }
  0x30   : > { %1178 = vmatprep.subr.bf16.mxu0 %v1382_v0  ;;  %p1298_p10 = scmp.ne.s32.totalorder %s1644_s17, %s1297_s7  ;;  %s1301_s8 = sshll.u32 %s1384_s21, 4  ;;  %s1302_s8 = int_to_ptr.vmem [resolvable:$false] %s1301_s8 }
  0x31   : > { %s1303_s9 = scalar_lea.vmem %s1302_s8, 256  ;;  %p1304_p0 = scmp.lt.s32.totalorder %s1644_s17, %s1302_s8 }
  0x32   : > { %p1299_p11 = pnand %p1298_p10, %p1455_p4  ;;  %p1305_p1 = scmp.lt.s32.totalorder %s1303_s9, %s1297_s7 }
  0x33   : > { %1179 = vmatpush3.bf16.msra.mxu0 %v1266_v7 }
  0x34   : > { %1180 = vmatprep.subr.bf16.mxu0 %v1382_v0  ;;  %v279_v13 = vld [vmem:[#allocation2 + $0x16] sm:$0xff]  ;;  %p1300_p13 = pneg %p1299_p11  ;;  %p1306_p2 = por %p1305_p1, %p1304_p0 }
  0x35   : > { %v289_v14 = vmul.f32 %v1078_v10, %v279_v13  ;;  %v299_v15 = vld [vmem:[#allocation2 + $0x18] sm:$0xff]  ;;  %342 = vst [vmem:[#allocation2 + $0xf] sm:$0xff] %v1382_v0 }
  0x36   : > { %v309_v17 = vmul.f32 %v1079_v12, %v299_v15  ;;  %343 = vst [vmem:[#allocation2 + $0x1f] sm:$0xff] %v1382_v0  ;;  %v1107_v12 = vld [vmem:[%s1689_s1 + $0x26] ss:$0 sm:$0xff]  ;;  %v1109_v15 = vld [vmem:[%s1689_s1 + $0x28] ss:$0 sm:$0xff]  ;;  %p1307_p3 = pnand %p1306_p2, %p1300_p13 }
  0x37   : > { %1181 = vmatpush3.bf16.msra.mxu0 %v1267_v9  ;;  %v294_v18 = vadd.f32 %v289_v14, %v274_v11 }
  0x38   : > { %1182 = vmatprep.subr.bf16.mxu0 %v1382_v0 }
  0x39   : > { %v314_v20 = vadd.f32 %v309_v17, %v294_v18  ;;  %v1111_v18 = vld [vmem:[%s1689_s1 + $0x29] ss:$0 sm:$0xff] }
  0x3b   : > { %1183 = vmatpush3.bf16.msra.mxu0 %v1268_v16  ;;  %v324_v22 = vadd.f32 %v1080_v19, %v314_v20 }
  0x3c   : > { %1184 = vmatprep.subr.bf16.mxu0 %v1382_v0 }
  0x3d   : > { %v329_v23 = vmax.f32 %v324_v22, 0.0 }
  0x3f   : > { %1185 = vmatpush3.bf16.msra.mxu0 %v1269_v21  ;;  %334 = vst [vmem:[#allocation2 + $0x17] sm:$0xff] %v329_v23  ;;  %v353_v28 = vmul.f32 %v1082_v25, %v329_v23  ;;  %v1113_v21 = vld [vmem:[%s1689_s1 + $0x2a] ss:$0 sm:$0xff] }
  0x40   : > { %1186 = vmatprep.subr.bf16.mxu0 %v1382_v0 }
  0x43   : > { %1187 = vmatpush3.bf16.msra.mxu0 %v1270_v24 }
  0x46   : > { %v358_v30 = vld [vmem:[#allocation2 + $0x14] sm:$0xff] }
  0x47   : > { %v378_v31 = vld [vmem:[#allocation2 + $0x15] sm:$0xff]  ;;  %v368_v33 = vmul.f32 %v1084_v26, %v358_v30  ;;  %v1117_v26 = vld [vmem:[%s1689_s1 + $0x2c] ss:$0 sm:$0xff] }
  0x48   : > { %v398_v32 = vld [vmem:[#allocation2 + $0x16] sm:$0xff]  ;;  %v388_v34 = vmul.f32 %v1086_v27, %v378_v31 }
  0x49   : > { %v418_v35 = vld [vmem:[#allocation2 + $0x18] sm:$0xff]  ;;  %501 = vst [vmem:[#allocation2 + $0xf] sm:$0xff] %v1382_v0  ;;  %v373_v39 = vadd.f32 %v368_v33, %v353_v28  ;;  %v408_v40 = vmul.f32 %v1088_v29, %v398_v32  ;;  %v1118_v32 = vld [vmem:[%s1690_s2 + $0x2] ss:$0 sm:$0xff] }
  0x4a   : > { %v438_v36 = vld [vmem:[#allocation2 + $0x19] sm:$0xff]  ;;  %v428_v43 = vmul.f32 %v1090_v38, %v418_v35  ;;  %v1124_v38 = vld [vmem:[%s1689_s1 + $0x31] ss:$0 sm:$0xff] }
  0x4b   : > { %v458_v37 = vld [vmem:[#allocation2 + $0x1a] sm:$0xff]  ;;  %v393_v42 = vadd.f32 %v388_v34, %v373_v39  ;;  %v448_v46 = vmul.f32 %v1092_v41, %v438_v36  ;;  %v1120_v36 = vld [vmem:[%s1689_s1 + $0x37] ss:$0 sm:$0xff] }
  0x4c   : > { %502 = vst [vmem:[#allocation2 + $0x1f] sm:$0xff] %v1382_v0  ;;  %v468_v48 = vmul.f32 %v1094_v44, %v458_v37  ;;  %v1122_v37 = vld [vmem:[%s1689_s1 + $0x30] ss:$0 sm:$0xff] }
  0x4d   : > { %v413_v45 = vadd.f32 %v408_v40, %v393_v42  ;;  %v1126_v40 = vld [vmem:[%s1689_s1 + $0x32] ss:$0 sm:$0xff] }
  0x4f   : > { %v433_v47 = vadd.f32 %v428_v43, %v413_v45 }
  0x51   : > { %v453_v49 = vadd.f32 %v448_v46, %v433_v47  ;;  %v1128_v47 = vld [vmem:[%s1689_s1 + $0x33] ss:$0 sm:$0xff] }
  0x53   : > { %v473_v51 = vadd.f32 %v468_v48, %v453_v49 }
  0x55   : > { %v483_v52 = vadd.f32 %v1095_v50, %v473_v51  ;;  %v1130_v51 = vld [vmem:[%s1689_s1 + $0x34] ss:$0 sm:$0xff] }
  0x57   : > { %v488_v53 = vmax.f32 %v483_v52, 0.0 }
  0x59   : > { %v1545_v54 = vadd.f32 %v488_v53, %v329_v23  ;;  %494 = vst [vmem:[#allocation2 + $0x17] sm:$0xff] %v488_v53  ;;  %v512_v58 = vmul.f32 %v1097_v55, %v488_v53  ;;  %v1115_v23 = vld [vmem:[%s1689_s1 + $0x2b] ss:$0 sm:$0xff] }
  0x60   : > { %v517_v59 = vld [vmem:[#allocation2 + $0x12] sm:$0xff]  ;;  %v518_v62 = vld [vmem:[#allocation2 + $0x1a] sm:$0xff] }
  0x61   : > { %v537_v60 = vld [vmem:[#allocation2 + $0x13] sm:$0xff]  ;;  %v527_v63 = vmul.f32 %v1099_v56, %v517_v59  ;;  %v538_v4 = vld [vmem:[#allocation2 + $0x1b] sm:$0xff]  ;;  %v663_v25 = vmul.f32 %v1113_v21, %v518_v62 }
  0x62   : > { %v547_v1 = vmul.f32 %v1101_v57, %v537_v60  ;;  %v557_v2 = vld [vmem:[#allocation2 + $0x14] sm:$0xff]  ;;  %v558_v8 = vld [vmem:[#allocation2 + $0x1c] sm:$0xff]  ;;  %v679_v28 = vmul.f32 %v1115_v23, %v538_v4 }
  0x63   : > { %v577_v5 = vld [vmem:[#allocation2 + $0x15] sm:$0xff]  ;;  %v532_v7 = vadd.f32 %v527_v63, %v512_v58  ;;  %v567_v9 = vmul.f32 %v1103_v61, %v557_v2  ;;  %v695_v30 = vmul.f32 %v1117_v26, %v558_v8  ;;  %v1146_v21 = vld [vmem:[%s1689_s1 + $0x3d] ss:$0 sm:$0xff] }
  0x64   : > { %v597_v6 = vld [vmem:[#allocation2 + $0x16] sm:$0xff]  ;;  %v587_v14 = vmul.f32 %v1105_v3, %v577_v5  ;;  %v1132_v56 = vld [vmem:[%s1689_s1 + $0x35] ss:$0 sm:$0xff] }
  0x65   : > { %v617_v10 = vld [vmem:[#allocation2 + $0x18] sm:$0xff]  ;;  %728 = vst [vmem:[#allocation2 + $0xf] sm:$0xff] %v1382_v0  ;;  %v552_v13 = vadd.f32 %v547_v1, %v532_v7  ;;  %v607_v17 = vmul.f32 %v1107_v12, %v597_v6  ;;  %v1134_v60 = vld [vmem:[%s1689_s1 + $0x36] ss:$0 sm:$0xff] }
  0x66   : > { %v637_v11 = vld [vmem:[#allocation2 + $0x19] sm:$0xff]  ;;  %v627_v20 = vmul.f32 %v1109_v15, %v617_v10  ;;  %v1136_v1 = vld [vmem:[%s1689_s1 + $0x38] ss:$0 sm:$0xff] }
  0x67   : > { %729 = vst [vmem:[#allocation2 + $0x1f] sm:$0xff] %v1382_v0  ;;  %v572_v16 = vadd.f32 %v567_v9, %v552_v13  ;;  %v647_v0 = vmul.f32 %v1111_v18, %v637_v11  ;;  %v1138_v5 = vld [vmem:[%s1689_s1 + $0x39] ss:$0 sm:$0xff]  ;;  %v1140_v9 = vld [vmem:[%s1689_s1 + $0x3a] ss:$0 sm:$0xff] }
  0x68   : > { %v1142_v13 = vld [vmem:[%s1689_s1 + $0x3b] ss:$0 sm:$0xff] }
  0x69   : > { %v592_v19 = vadd.f32 %v587_v14, %v572_v16 }
  0x6b   : > { %v612_v22 = vadd.f32 %v607_v17, %v592_v19  ;;  %v1144_v17 = vld [vmem:[%s1689_s1 + $0x3c] ss:$0 sm:$0xff] }
  0x6d   : > { %v632_v24 = vadd.f32 %v627_v20, %v612_v22 }
  0x6f   : > { %v652_v27 = vadd.f32 %v647_v0, %v632_v24  ;;  %v1148_v24 = vld [vmem:[%s1689_s1 + $0x3e] ss:$0 sm:$0xff] }
  0x71   : > { %v668_v29 = vadd.f32 %v663_v25, %v652_v27 }
  0x73   : > { %v684_v31 = vadd.f32 %v679_v28, %v668_v29 }
  0x75   : > { %v700_v33 = vadd.f32 %v695_v30, %v684_v31  ;;  %v1149_v30 = vld [vmem:[%s1690_s2 + $0x3] ss:$0 sm:$0xff] }
  0x77   : > { %v710_v34 = vadd.f32 %v1118_v32, %v700_v33 }
  0x79   : > { %v715_v35 = vmax.f32 %v710_v34, 0.0 }
  0x7b   : > { %721 = vst [vmem:[#allocation2 + $0x17] sm:$0xff] %v715_v35  ;;  %v737_v39 = vmul.f32 %v1120_v36, %v715_v35  ;;  %v718_v32 = vadd.f32 %v715_v35, %v1545_v54 }
  0x82   : > { %v738_v41 = vld [vmem:[#allocation2 + $0x10] sm:$0xff]  ;;  %v794_v63 = vld [vmem:[#allocation2 + $0x18] sm:$0xff] }
  0x83   : > { %v746_v42 = vld [vmem:[#allocation2 + $0x11] sm:$0xff]  ;;  %v744_v44 = vmul.f32 %v1122_v37, %v738_v41  ;;  %v802_v4 = vld [vmem:[#allocation2 + $0x19] sm:$0xff]  ;;  %v800_v7 = vmul.f32 %v1136_v1, %v794_v63 }
  0x84   : > { %v754_v43 = vld [vmem:[#allocation2 + $0x12] sm:$0xff]  ;;  %v752_v45 = vmul.f32 %v1124_v38, %v746_v42  ;;  %v810_v8 = vld [vmem:[#allocation2 + $0x1a] sm:$0xff]  ;;  %v808_v11 = vmul.f32 %v1138_v5, %v802_v4 }
  0x85   : > { %v762_v46 = vld [vmem:[#allocation2 + $0x13] sm:$0xff]  ;;  %v745_v48 = vadd.f32 %v744_v44, %v737_v39  ;;  %v760_v49 = vmul.f32 %v1126_v40, %v754_v43  ;;  %v818_v12 = vld [vmem:[#allocation2 + $0x1b] sm:$0xff]  ;;  %v816_v15 = vmul.f32 %v1140_v9, %v810_v8 }
  0x86   : > { %v770_v50 = vld [vmem:[#allocation2 + $0x14] sm:$0xff]  ;;  %v768_v53 = vmul.f32 %v1128_v47, %v762_v46  ;;  %v826_v16 = vld [vmem:[#allocation2 + $0x1c] sm:$0xff]  ;;  %v824_v19 = vmul.f32 %v1142_v13, %v818_v12 }
  0x87   : > { %v753_v52 = vadd.f32 %v752_v45, %v745_v48  ;;  %v778_v55 = vld [vmem:[#allocation2 + $0x15] sm:$0xff]  ;;  %v776_v58 = vmul.f32 %v1130_v51, %v770_v50  ;;  %v834_v20 = vld [vmem:[#allocation2 + $0x1d] sm:$0xff]  ;;  %v832_v0 = vmul.f32 %v1144_v17, %v826_v16 }
  0x88   : > { %v786_v59 = vld [vmem:[#allocation2 + $0x16] sm:$0xff]  ;;  %v784_v62 = vmul.f32 %v1132_v56, %v778_v55  ;;  %v842_v23 = vld [vmem:[#allocation2 + $0x1e] sm:$0xff]  ;;  %v840_v26 = vmul.f32 %v1146_v21, %v834_v20 }
  0x89   : > { %v761_v57 = vadd.f32 %v760_v49, %v753_v52  ;;  %v792_v3 = vmul.f32 %v1134_v60, %v786_v59  ;;  %v848_v28 = vmul.f32 %v1148_v24, %v842_v23  ;;  %v1150_v38 = vld [vmem:[%s1692_s4] ss:$0 sm:$0xff] }
  0x8b   : > { %v769_v61 = vadd.f32 %v768_v53, %v761_v57 }
  0x8d   : > { %v777_v2 = vadd.f32 %v776_v58, %v769_v61 }
  0x8f   : > { %v785_v6 = vadd.f32 %v784_v62, %v777_v2 }
  0x91   : > { %v793_v10 = vadd.f32 %v792_v3, %v785_v6 }
  0x93   : > { %v801_v14 = vadd.f32 %v800_v7, %v793_v10 }
  0x95   : > { %v809_v18 = vadd.f32 %v808_v11, %v801_v14 }
  0x97   : > { %v817_v22 = vadd.f32 %v816_v15, %v809_v18 }
  0x99   : > { %v825_v25 = vadd.f32 %v824_v19, %v817_v22 }
  0x9b   : > { %v833_v27 = vadd.f32 %v832_v0, %v825_v25 }
  0x9d   : > { %v841_v29 = vadd.f32 %v840_v26, %v833_v27 }
  0x9f   : > { %v849_v31 = vadd.f32 %v848_v28, %v841_v29 }
  0xa1   : > { %v855_v33 = vadd.f32 %v1149_v30, %v849_v31 }
  0xa3   : > { %v856_v34 = vmax.f32 %v855_v33, 0.0 }
  0xa5   : > { %v857_v36 = vadd.f32 %v856_v34, %v718_v32 }
  0xa7   : > { %v858_v37 = vpack.c.bf16 %v857_v36, %v857_v36 }
  0xa9   : > { %1189 = vmatmul.mubr.bf16.vlgmr.msra.gmra.mxu0 %v858_v37 }
 0x169   : > { %v964_v39 = vpop.f32.mrf.mxu0 }
 0x16a   : > { %v965_v40 = vadd.f32 %v1150_v38, %v964_v39 }
 0x16b   : > { %v1190_v54 = vpop.f32.mrf.mxu0 }
 0x16c   : > { %970 = vst [vmem:[%s246_s16] sm:$0xff] %v965_v40 }
 0x16d   : > { %v967_v35 = vpop.f32.mrf.mxu0 }
 0x16e   : > { %1310 = shalt.err (!%p1307_p3)
}
 0x16f   : > { %s1311_s10 = scalar_lea.hbm %s1642_s27, 128  ;;  %s1315_s13 = scalar_lea.hbm %s1693_s5, 256 }
 0x170   : > { %p1312_p5 = scmp.ne.s32.totalorder %s1642_s27, %s1311_s10  ;;  %p1316_p9 = scmp.lt.s32.totalorder %s1642_s27, %s1693_s5 }
 0x171   : > { %p1317_p12 = scmp.lt.s32.totalorder %s1315_s13, %s1311_s10 }
 0x172   : > { %p1313_p6 = pnand %p1312_p5, %p1455_p4 }
 0x173   : > { %p1318_p10 = por %p1317_p12, %p1316_p9 }
 0x174   : > { %p1314_p7 = pneg %p1313_p6 }
 0x176   : > { %p1319_p11 = pnand %p1318_p10, %p1314_p7 }
 0x178   : > { %1322 = shalt.err (!%p1319_p11)
}
 0x179   : > { %1197 = dma.vmem_to_hbm [thread:$0]  (%p1455_p4), %s1644_s17, 128, %s1642_s27, %s972_s29   ;;  %v1191_v41 = vpop.f32.mrf.mxu0 }
 0x17a PF: > { %p1209_p13 = scmp.ge.s32.totalorder %s1377_s23, 2  ;;  %s998_s16 = sand.u32 1, %s1357_s18  }
 0x17b   : > { %s999_s24 = scalar_lea.sflag [#allocation5], %s998_s16 }
 0x17c   : > { %p1204_p0 = pnand %p1209_p13, %p1462_p8 }
 0x17e   : > { %p1205_p1 = pneg %p1204_p0 }
 0x180   : > { %1352 = dma.done.wait (%p1205_p1), %s999_s24, 128  }
 0x181   : > { %1354 = vsyncadd (%p1205_p1), %s999_s24, 4294967168  ;;  %s19_s23 = sadd.s32 1, %s1377_s23   ;;  %s1698_s18 = smov %s1361_s19 }
 0x182   : > { %p16_p2 = scmp.ge.s32.totalorder %s19_s23, 4   ;;  %s1699_s19 = smov %s1365_s20 }
 0x183   : > { %s1700_s20 = smov %s1468_s6  ;;  %s1701_s21 = smov %s1373_s22 }
 0x184   : > { %s1702_s22 = smov %s1704_s26  ;;  %18 = sbr.rel (!%p16_p2) target bundleno = 5 (0x5), region = 96 }
 0x189   :  { %1004 = vsyncpa [#allocation4], 1 }
 0x18a   :  { %1006 = vsyncpa [#allocation4 + $0x1], 1 }
 0x18b   :  { %1007 = vsyncpa [#allocation5], 1 }
 0x18c   :  { %1009 = vsyncpa [#allocation5 + $0x1], 1 }

</bundles_post_ra>
